<compile_context>
chip_gen: v7x
topology: tpu7x:2x2x1
jax: 0.10.0
libtpu: 0.0.40
codegen_flags: <defaults>
</compile_context>

<pallas_src>
import functools

import jax
import jax.numpy as jnp
from jax.experimental import pallas as pl
from jax.experimental.pallas import tpu as pltpu


def _fused_kernel(x_ref, wt_ref, o_ref, *, inv_hw):
    """One grid step: (Bt, C, HWp) slab -> pooled gate -> channel-wise scale."""
    x = x_ref[...]                                                   # native dtype
    # Global average pool: padded lanes are zero, so sum * (1/true_HW) is exact.
    pooled = jnp.sum(x, axis=-1, dtype=jnp.float32) * inv_hw         # (Bt, C) f32
    # Linear (no bias): wt_ref holds W^T, so this is pooled @ W^T.
    y = jnp.dot(pooled, wt_ref[...], preferred_element_type=jnp.float32)
    y = jax.nn.sigmoid(jnp.maximum(y, 0.0))                          # ReLU -> Sigmoid
    # Channel-wise scale kept in the input dtype (no f32 copy of the slab).
    o_ref[...] = x * y.astype(x.dtype)[:, :, None]


def _scale_kernel(x_ref, y_ref, o_ref):
    """Pure channel-scale pass used by the small-VMEM fallback."""
    o_ref[...] = x_ref[...] * y_ref[...]


def ham_block(x, w, *, vmem_slab_budget_bytes=6 * 1024 * 1024):
    """x: (B, C, H, W) NCHW; w: (C, C) PyTorch Linear weight (out, in)."""
    b, c, h, wsp = x.shape
    hw = h * wsp
    itemsize = jnp.dtype(x.dtype).itemsize

    # Lane-dense spatial axis: pad HW up to a multiple of 128.
    hw_pad = pl.cdiv(hw, 128) * 128
    x2 = x.reshape(b, c, hw)
    if hw_pad != hw:
        x2 = jnp.pad(x2, ((0, 0), (0, 0), (0, hw_pad - hw)))

    wt = w.T.astype(jnp.float32)                     # (in, out): kernel does pooled @ W^T

    slab_bytes = c * hw_pad * itemsize               # one batch element's slab
    if slab_bytes <= vmem_slab_budget_bytes:
        # ---------------- fused single-pass path ----------------
        bt = max(1, min(b, vmem_slab_budget_bytes // slab_bytes))
        if b >= 2:
            bt = min(bt, pl.cdiv(b, 2))              # keep >=2 parallel steps (v7x: 2 TCs)
        b_pad = pl.cdiv(b, bt) * bt
        if b_pad != b:                               # zero rows -> gate 0.5 * 0 = 0, sliced off
            x2 = jnp.pad(x2, ((0, b_pad - b), (0, 0), (0, 0)))

        block_bytes = bt * slab_bytes
        vmem_limit = int(min(48 * 1024 * 1024,
                             max(16 * 1024 * 1024,
                                 5 * block_bytes + c * c * 4 + (2 << 20))))
        cost = pl.CostEstimate(
            flops=2 * b * c * hw + 2 * b * c * c,
            transcendentals=b * c,
            bytes_accessed=2 * b * c * hw * itemsize + c * c * 4)

        out = pl.pallas_call(
            functools.partial(_fused_kernel, inv_hw=1.0 / hw),
            out_shape=jax.ShapeDtypeStruct((b_pad, c, hw_pad), x.dtype),
            grid=(b_pad // bt,),
            in_specs=[
                pl.BlockSpec((bt, c, hw_pad), lambda i: (i, 0, 0)),
                pl.BlockSpec((c, c), lambda i: (0, 0)),
            ],
            out_specs=pl.BlockSpec((bt, c, hw_pad), lambda i: (i, 0, 0)),
            compiler_params=pltpu.CompilerParams(
                dimension_semantics=("parallel",),
                vmem_limit_bytes=vmem_limit),
            cost_estimate=cost,
        )(x2, wt)
        out = out[:b, :, :hw]
    else:
        # ------------- small-VMEM fallback (e.g. v7x, huge C*HW) -------------
        # Gate is tiny (B, C): compute it in plain XLA; Pallas does the
        # bandwidth-bound element-wise scale, tiled over the spatial axis.
        pooled = jnp.mean(x2[:, :, :hw].astype(jnp.float32), axis=-1)       # (B, C)
        y = jax.nn.sigmoid(jnp.maximum(pooled @ wt, 0.0)).astype(x.dtype)   # (B, C)
        y3 = y.reshape(b, c, 1)

        hw_t = max(128, (vmem_slab_budget_bytes // (c * itemsize) // 128) * 128)
        hw_t = min(hw_t, hw_pad)
        hw_pad2 = pl.cdiv(hw_pad, hw_t) * hw_t
        if hw_pad2 != hw_pad:
            x2 = jnp.pad(x2, ((0, 0), (0, 0), (0, hw_pad2 - hw_pad)))

        block_bytes = c * hw_t * itemsize
        vmem_limit = int(min(48 * 1024 * 1024,
                             max(16 * 1024 * 1024, 5 * block_bytes + (2 << 20))))
        cost = pl.CostEstimate(
            flops=b * c * hw, transcendentals=0,
            bytes_accessed=2 * b * c * hw * itemsize)

        out = pl.pallas_call(
            _scale_kernel,
            out_shape=jax.ShapeDtypeStruct((b, c, hw_pad2), x.dtype),
            grid=(b, hw_pad2 // hw_t),
            in_specs=[
                pl.BlockSpec((1, c, hw_t), lambda i, j: (i, 0, j)),
                pl.BlockSpec((1, c, 1), lambda i, j: (i, 0, 0)),
            ],
            out_specs=pl.BlockSpec((1, c, hw_t), lambda i, j: (i, 0, j)),
            compiler_params=pltpu.CompilerParams(
                dimension_semantics=("parallel", "parallel"),
                vmem_limit_bytes=vmem_limit),
            cost_estimate=cost,
        )(x2, y3)
        out = out[:, :, :hw]

    return out.reshape(b, c, h, wsp)


def ham_block_ref(x, w):
    """Plain-JAX reference matching the PyTorch module."""
    y = jnp.mean(x, axis=(2, 3))                     # (B, C)
    y = y @ w.T                                      # Linear, no bias
    y = jax.nn.sigmoid(jnp.maximum(y, 0.0))
    return x * y[:, :, None, None]


def _check(x, w, **kwargs):
    out = jax.block_until_ready(ham_block(x, w, **kwargs))
    ref = ham_block_ref(x, w)
    assert out.shape == x.shape
    assert jnp.allclose(out, ref, atol=1e-5, rtol=1e-5), "mismatch vs reference"


if __name__ == "__main__":
    key = jax.random.PRNGKey(0)
    kx, kw, kx2, kw2 = jax.random.split(key, 4)

    # Primary test: B=2, C=4, 16x16 (HW=256, already a multiple of 128).
    B, C, H, W = 2, 4, 16, 16
    x = jax.random.normal(kx, (B, C, H, W), dtype=jnp.float32)
    bound = 1.0 / jnp.sqrt(C)
    w = jax.random.uniform(kw, (C, C), dtype=jnp.float32, minval=-bound, maxval=bound)
    _check(x, w)

    # Extra coverage: non-128-multiple HW (7x7 -> padded) and Bt > 1 with batch padding.
    B2, C2, H2, W2 = 5, 8, 7, 7
    x_b = jax.random.normal(kx2, (B2, C2, H2, W2), dtype=jnp.float32)
    bound2 = 1.0 / jnp.sqrt(C2)
    w_b = jax.random.uniform(kw2, (C2, C2), dtype=jnp.float32, minval=-bound2, maxval=bound2)
    _check(x_b, w_b)

    # Extra coverage: force the small-VMEM (v7x-style) fallback path.
    _check(x, w, vmem_slab_budget_bytes=1024)

    print("KERNEL_OK")
</pallas_src>

<mosaic_0001>
module attributes {stable_mosaic.version = 11 : i64} {
  func.func @_fused_kernel(%arg0: i32, %arg1: memref<1x4x256xf32, #tpu.memory_space<vmem>>, %arg2: memref<4x4xf32, #tpu.memory_space<vmem>>, %arg3: memref<1x4x256xf32, #tpu.memory_space<vmem>>) attributes {dimension_semantics = [#tpu.dimension_semantics<parallel>], iteration_bounds = array<i64: 2>, scalar_prefetch = 0 : i64, scratch_operands = 0 : i64, tpu.core_type = #tpu.core_type<tc>, window_params = [{transform_indices = @transform_0, window_bounds = array<i64: 1, 4, 256>}, {pipeline_mode = #tpu.pipeline_mode<synchronous>, transform_indices = @transform_1, window_bounds = array<i64: 4, 4>}, {transform_indices = @transform_2, window_bounds = array<i64: 1, 4, 256>}]} {
    %c0 = arith.constant 0 : index
    %c0_0 = arith.constant 0 : index
    %c0_1 = arith.constant 0 : index
    %0 = vector.load %arg1[%c0, %c0_0, %c0_1] : memref<1x4x256xf32, #tpu.memory_space<vmem>>, vector<1x4x256xf32>
    %cst = arith.constant dense<0.000000e+00> : vector<1x4xf32>
    %1 = vector.multi_reduction <add>, %0, %cst [2] : vector<1x4x256xf32> to vector<1x4xf32>
    %cst_2 = arith.constant 3.906250e-03 : f32
    %2 = vector.broadcast %cst_2 : f32 to vector<1x4xf32>
    %3 = arith.mulf %1, %2 : vector<1x4xf32>
    %c0_3 = arith.constant 0 : index
    %c0_4 = arith.constant 0 : index
    %4 = vector.load %arg2[%c0_3, %c0_4] : memref<4x4xf32, #tpu.memory_space<vmem>>, vector<4x4xf32>
    %cst_5 = arith.constant dense<0.000000e+00> : vector<1x4xf32>
    %5 = tpu.matmul %3, %4, %cst_5 {dimension_numbers = #tpu.dot_dimension_numbers<[1], [0], [0], [1], [0, 0, 1, 1], [], []>} : vector<1x4xf32>, vector<4x4xf32>, vector<1x4xf32> -> vector<1x4xf32>
    %cst_6 = arith.constant 0.000000e+00 : f32
    %6 = vector.broadcast %cst_6 : f32 to vector<1x4xf32>
    %7 = arith.maximumf %5, %6 : vector<1x4xf32>
    %8 = arith.negf %7 : vector<1x4xf32>
    %9 = math.exp %8 : vector<1x4xf32>
    %cst_7 = arith.constant 1.000000e+00 : f32
    %10 = vector.broadcast %cst_7 : f32 to vector<1x4xf32>
    %11 = arith.addf %10, %9 : vector<1x4xf32>
    %12 = arith.divf %10, %11 : vector<1x4xf32>
    %13 = vector.shape_cast %12 : vector<1x4xf32> to vector<1x4x1xf32>
    %14 = vector.broadcast %13 : vector<1x4x1xf32> to vector<1x4x256xf32>
    %15 = arith.mulf %0, %14 : vector<1x4x256xf32>
    %c0_8 = arith.constant 0 : index
    %c0_9 = arith.constant 0 : index
    %c0_10 = arith.constant 0 : index
    %16 = vector.load %arg3[%c0_8, %c0_9, %c0_10] : memref<1x4x256xf32, #tpu.memory_space<vmem>>, vector<1x4x256xf32>
    tpu.vector_store %arg3[%c0_8, %c0_9, %c0_10], %15 {strides = array<i32>} : memref<1x4x256xf32, #tpu.memory_space<vmem>>, vector<1x4x256xf32>,
    return
  }
  func.func @transform_0(%arg0: i32) -> (i32, i32, i32) {
    %c0_i32 = arith.constant 0 : i32
    %c0_i32_0 = arith.constant 0 : i32
    %c0_i32_1 = arith.constant 0 : i32
    return %arg0, %c0_i32, %c0_i32_0 : i32, i32, i32
  }
  func.func @transform_1(%arg0: i32) -> (i32, i32) {
    %c0_i32 = arith.constant 0 : i32
    %c0_i32_0 = arith.constant 0 : i32
    %c0_i32_1 = arith.constant 0 : i32
    return %c0_i32, %c0_i32_0 : i32, i32
  }
  func.func @transform_2(%arg0: i32) -> (i32, i32, i32) {
    %c0_i32 = arith.constant 0 : i32
    %c0_i32_0 = arith.constant 0 : i32
    %c0_i32_1 = arith.constant 0 : i32
    return %arg0, %c0_i32, %c0_i32_0 : i32, i32, i32
  }
}

</mosaic_0001>

<bundles_post_ra>
// kernel: tpu_custom_call.1
= control target key start
LH: loop header
LB: loop body
LE: loop exit
PB: predicated region body
PF: predicated region fallthrough
CT: control target
= control target key end

     0   :  { %7 = vsyncpa [#allocation3], 0  ;;  %s837_s0 = inlined_call_operand.hbm [shape: f32[2,4,256], index: 0, kind: input, shape index: {}]   ;;  %s838_s1 = inlined_call_operand.hbm [shape: f32[4,4], index: 1, kind: input, shape index: {}]   ;;  %s839_s2 = inlined_call_operand.hbm [shape: f32[2,4,256], index: 2, kind: output, shape index: {}]  }
   0x1   :  { %9 = vsyncpa [#allocation3 + $0x1], 0 }
   0x2   :  { %10 = vsyncpa [#allocation6], 0 }
   0x3   :  { %11 = vsyncpa [#allocation4], 0 }
   0x4   :  { %13 = vsyncpa [#allocation4 + $0x1], 0  ;;  %s632_s9 = smov 0   ;;  %s634_s10 = smov 0  }
   0x5   :  { %s636_s11 = smov 0   ;;  %s638_s12 = smov 0  }
   0x6 LB: > { %s653_s13 = sadd.s32 4294967295, %s609_s12   ;;  %s388_s14 = sadd.s32 4294967294, %s609_s12   ;;  %s609_s12 = sphi %s638_s12, %s863_s12   ;;  %s605_s11 = sphi %s636_s11, %s862_s11   ;;  %s601_s10 = sphi %s634_s10, %s861_s10   ;;  %s597_s9 = sphi %s632_s9, %s860_s9  }
   0x7   : > { %p39_p0 = scmp.ne.s32.totalorder %s601_s10, %s597_s9  ;;  %p840_p1 = scmp.eq.s32.totalorder %s653_s13, 0 }
   0x8   : > { %p90_p3 = scmp.eq.s32.totalorder %s388_s14, 1  ;;  %p389_p5 = scmp.ge.s32.totalorder %s609_s12, 1 }
   0x9   : > { %p662_p4 = por %p840_p1, %p39_p0  ;;  %p97_p7 = scmp.lt.s32.totalorder %s609_s12, 3 }
   0xa   : > { %p667_p6 = por %p90_p3, %p39_p0  ;;  %s611_s18 = smov [#allocation5]  }
   0xb   : > { %s843_s15 = scalar_select %p662_p4, 1, 0 }
   0xc   : > { %s844_s16 = scalar_select %p667_p6, 1, 0 }
   0xd   : > { %p672_p8 = pnand %p389_p5, %p97_p7  ;;  %s110_s19 = sshll.u32 %s611_s18, 4  ;;  %s111_s19 = int_to_ptr.vmem [resolvable:$true] %s110_s19 }
   0xe   : > { %s680_s20 = sadd.s32 1, %s609_s12   ;;  %s26_s24 = sadd.s32 1, %s605_s11 }
   0xf   : > { %s845_s17 = scalar_select %p672_p8, 1, 0 }
  0x10   : > { %p424_p10 = pneg %p672_p8  ;;  %s23_s22 = ssub.s32 %s609_s12, %s680_s20 }
  0x11   : > { %p690_p12 = scmp.eq.s32.totalorder %s23_s22, 0  ;;  %s481_s27 = scalar_lea.hbm %s838_s1, 64 }
  0x12   : > { %p684_p11 = pnand %p424_p10, %p840_p1  ;;  %p482_p0 = scmp.ne.s32.totalorder %s838_s1, %s481_s27 }
  0x13   : > { %s847_s23 = scalar_select %p690_p12, 1, 0 }
  0x14   : > { %p483_p3 = pneg %p684_p11  ;;  %p488_p10 = scmp.lt.u32.totalorder %s481_s27, %s838_s1 }
  0x16   : > { %p484_p5 = pnand %p483_p3, %p482_p0 }
  0x18   : > { %p485_p7 = pneg %p484_p5 }
  0x1a   : > { %p490_p9 = pnand %p488_p10, %p485_p7 }
  0x1c   : > { %493 = shalt.err (!%p490_p9)
}
  0x1d   : > { %s494_s4 = scalar_lea.vmem %s111_s19, 64  ;;  %p502_p6 = scmp.lt.s32.totalorder %s111_s19, %s111_s19 }
  0x1e   : > { %p495_p1 = scmp.ne.s32.totalorder %s111_s19, %s494_s4  ;;  %p503_p4 = scmp.lt.s32.totalorder %s494_s4, %s494_s4 }
  0x20   : > { %p497_p2 = pnand %p495_p1, %p483_p3  ;;  %p504_p8 = por %p503_p4, %p502_p6 }
  0x22   : > { %p498_p13 = pneg %p497_p2 }
  0x24   : > { %p505_p12 = pnand %p504_p8, %p498_p13 }
  0x26   : > { %508 = shalt.err (!%p505_p12)
}
  0x27   : > { %427 = dma.hbm_to_vmem [thread:$0]  (!%p684_p11), %s838_s1, 64, %s111_s19, [#allocation6]  }
  0x28   : > { %p848_p1 = scmp.ne.s32.totalorder %s847_s23, 0  ;;  %p34_p2 = scmp.eq.s32.totalorder %s609_s12, 0 }
  0x29   : > { %p849_p4 = scmp.ne.s32.totalorder %s605_s11, %s601_s10  ;;  %p850_p6 = scmp.eq.s32.totalorder %s653_s13, 1 }
  0x2a   : > { %s716_s7 = scalar_select %p848_p1, %s605_s11, %s26_s24  }
  0x2b   : > { %p724_p8 = por %p850_p6, %p849_p4  ;;  %p437_p9 = scmp.lt.s32.totalorder %s609_s12, 2 }
  0x2c   : > { %s121_s14 = sand.u32 1, %s605_s11   ;;  %p852_p12 = pmov %p849_p4 }
  0x2d   : > { %s392_s18 = sshll.u32 %s121_s14, 3  ;;  %s407_s21 = sshll.u32 %s609_s12, 7 }
  0x2e   : > { %p35_p13 = por %p34_p2, %p852_p12  ;;  %s737_s19 = scalar_lea.hbm %s837_s0, %s407_s21 }
  0x2f   : > { %s125_s23 = scalar_lea.vmem [#allocation2], %s392_s18  ;;  %s122_s27 = scalar_lea.sflag [#allocation3], %s121_s14 }
  0x30   : > { %s133_s24 = sshll.u32 %s125_s23, 4  ;;  %p739_p11 = pnand %p437_p9, %p35_p13  ;;  %s743_s24 = int_to_ptr.vmem [resolvable:$true] %s133_s24 }
  0x31   : > { %s509_s28 = scalar_lea.hbm %s737_s19, 128  ;;  %s514_s3 = scalar_lea.hbm %s837_s0, 256 }
  0x32   : > { %p510_p0 = scmp.ne.s32.totalorder %s737_s19, %s509_s28  ;;  %p511_p3 = pneg %p739_p11 }
  0x33   : > { %p515_p10 = scmp.lt.u32.totalorder %s737_s19, %s837_s0  ;;  %p516_p1 = scmp.lt.u32.totalorder %s514_s3, %s509_s28 }
  0x34   : > { %p512_p5 = pnand %p511_p3, %p510_p0  ;;  %p518_p4 = scmp.lt.u32.totalorder %s509_s28, %s737_s19 }
  0x35   : > { %p517_p2 = por %p516_p1, %p515_p10 }
  0x36   : > { %p513_p7 = pneg %p512_p5 }
  0x37   : > { %p519_p6 = por %p518_p4, %p517_p2 }
  0x39   : > { %p520_p9 = pnand %p519_p6, %p513_p7 }
  0x3b   : > { %523 = shalt.err (!%p520_p9)
}
  0x3c   : > { %s524_s6 = scalar_lea.vmem %s743_s24, 128  ;;  %s612_s14 = smov [#allocation2]  }
  0x3d   : > { %p525_p12 = scmp.ne.s32.totalorder %s743_s24, %s524_s6  ;;  %s529_s18 = sshll.u32 %s612_s14, 4  ;;  %s530_s18 = int_to_ptr.vmem [resolvable:$false] %s529_s18 }
  0x3e   : > { %s531_s21 = scalar_lea.vmem %s530_s18, 256  ;;  %p532_p5 = scmp.lt.s32.totalorder %s743_s24, %s530_s18 }
  0x3f   : > { %p527_p13 = pnand %p525_p12, %p511_p3  ;;  %p533_p10 = scmp.lt.s32.totalorder %s531_s21, %s524_s6 }
  0x41   : > { %p528_p0 = pneg %p527_p13  ;;  %p534_p1 = por %p533_p10, %p532_p5 }
  0x43   : > { %p535_p2 = pnand %p534_p1, %p528_p0 }
  0x45   : > { %538 = shalt.err (!%p535_p2)
}
  0x46   : > { %431 = dma.hbm_to_vmem [thread:$0]  (!%p739_p11), %s737_s19, 128, %s743_s24, %s122_s27  }
  0x47   : > { %p854_p7 = scmp.ne.s32.totalorder %s845_s17, 0 }
  0x48   : > { %s773_s22 = sand.u32 (!%p854_p7), 1, %s601_s10   ;;  %p855_p3 = scmp.ne.s32.totalorder (!%p854_p7), %s843_s15, 0 }
  0x49   : > { %142 = sbr.rel (%p854_p7) target bundleno = 611 (0x263), region = 28  ;;  %s396_s25 = sshll.u32 (!%p854_p7), %s773_s22, 3 }
  0x4a   : > { %s145_s23 = scalar_lea.sflag (!%p854_p7), [#allocation3], %s773_s22  ;;  %s148_s28 = scalar_lea.vmem (!%p854_p7), [#allocation2], %s396_s25 }
  0x50   : > { %584 = dma.done.wait (%p855_p3), %s145_s23, 128  }
  0x51   : > { %586 = vsyncadd (%p855_p3), %s145_s23, 4294967168  ;;  %p856_p11 = scmp.eq.s32.totalorder %s653_s13, 0 }
  0x53   : > { %588 = dma.done.wait (%p856_p11), [#allocation6], 64   ;;  %p857_p4 = pmov %p856_p11 }
  0x54   : > { %vm177_vm0 = vcmask 1043456   ;;  %v173_v0 = vld [vmem:[%s148_s28] sm:$0xff]  ;;  %v613_v5 = vmov 0.0   ;;  %v184_v6 = vld [vmem:[#allocation5] sm:$0xf]  ;;  %vm614_vm1 = vmmov 0   ;;  %v186_v7 = vlaneseq }
  0x55   : > { %590 = vsyncadd (%p857_p4), [#allocation6], 4294967232  ;;  %v175_v1 = vcombine.high %v173_v0, %v173_v0  ;;  %v178_v2 = vsel %vm177_vm0, %v173_v0, 0.0  ;;  %411 = vmatprep.subr.mxu0 %v613_v5  ;;  %413 = vmatprep.mubr.msk.f32.mxu0 %vm614_vm1, %v613_v5  ;;  %vm192_vm2 = vcmask 31744   ;;  %v615_v23 = vmov 839922192  }
  0x56   : > { %412 = vmatpush3.msk.msra.mxu0 %vm177_vm0, %v184_v6  ;;  %v187_v8 = vand.u32 127, %v186_v7  ;;  %v189_v9 = vshrl.u32 %v186_v7, 7  ;;  %v284_v24 = vunpack.c.l.s4 %v615_v23  ;;  %s408_s15 = sshll.u32 %s653_s13, 7  ;;  %s172_s17 = scalar_lea.vmem [#allocation7], %s396_s25 }
  0x57   : > { %v179_v3 = vsel %vm177_vm0, %v175_v1, 0.0  ;;  %s308_s19 = sshll.u32 %s172_s17, 4  ;;  %s793_s27 = scalar_lea.hbm %s839_s2, %s408_s15  ;;  %s795_s19 = int_to_ptr.vmem [resolvable:$true] %s308_s19 }
  0x58   : > { %v180_v4 = vadd.f32 %v179_v3, %v178_v2  ;;  %v190_v10 = vsub.s32 %v187_v8, %v189_v9  ;;  %v277_v20 = vsub.s32 0, %v189_v9  ;;  %v285_v25 = vunpack.c.0.s8 %v284_v24  ;;  %s294_s29 = scalar_lea.sflag [#allocation4], %s773_s22  ;;  %s539_s30 = scalar_lea.vmem %s795_s19, 128 }
  0x59   : > { %p540_p6 = scmp.ne.s32.totalorder %s795_s19, %s539_s30  ;;  %s616_s13 = smov [#allocation7]  }
  0x5a   : > { %181 = vadd.xlane.f32.xlu0 %v180_v4  ;;  %v288_v26 = vsub.s32 %v285_v25, %v189_v9  ;;  %s543_s3 = sshll.u32 %s616_s13, 4  ;;  %s544_s3 = int_to_ptr.vmem [resolvable:$false] %s543_s3 }
  0x5b   : > { %p541_p9 = pnand %p540_p6, %p724_p8  ;;  %s545_s4 = scalar_lea.vmem %s544_s3, 256 }
  0x5c   : > { %p546_p13 = scmp.lt.s32.totalorder %s795_s19, %s544_s3  ;;  %p547_p0 = scmp.lt.s32.totalorder %s545_s4, %s539_s30 }
  0x5d   : > { %p542_p12 = pneg %p541_p9 }
  0x5e   : > { %p548_p5 = por %p547_p0, %p546_p13 }
  0x60   : > { %p549_p10 = pnand %p548_p5, %p542_p12 }
  0xe7   : > { %v182_v11 = vpop.xlane.xlu0 %181 }
  0xe8   : > { %v183_v12 = vmul.f32 0.00390625, %v182_v11 }
  0xea   : > { %v191_v13 = vrot.slane %v183_v12, %v190_v10 }
  0xec   : > { %414 = vmatmul.mubr.msk.f32.vlgmr.msra.gmra.mrb[0].mxu0 %vm192_vm2, %v191_v13 }
 0x1bf   : > { %v264_v14 = vpop.f32.mrb[0].mxu0 }
 0x1c0   : > { %v268_v15 = vmax.f32 %v264_v14, 0.0  ;;  %v415_v16 = vpop.f32.mrb[1].mxu0 }
 0x1c2   : > { %v401_v17 = vmul.f32 -1.442695, %v268_v15 }
 0x1c4   : > { %477 = vpow2.f32 %v401_v17 }
 0x1ce   : > { %v478_v18 = vpop.eup %477 }
 0x1cf   : > { %v272_v19 = vadd.f32 1.0, %v478_v18 }
 0x1d1   : > { %479 = vrcp.f32 %v272_v19 }
 0x1db   : > { %v480_v21 = vpop.eup %479 }
 0x1dc   : > { %v278_v22 = vrot.slane %v480_v21, %v277_v20 }
 0x1de   : > { %280 = vbcast.lane.b32.xlu0 %v278_v22, 256 }
 0x250   : > { %v281_v27 = vpop.permute.xlu0 %280 }
 0x251   : > { %v289_v28 = vrot.slane %v281_v27, %v288_v26 }
 0x253   : > { %v291_v29 = vmul.f32 %v289_v28, %v173_v0 }
 0x255   : > { %292 = vst [vmem:[%s172_s17] sm:$0xff] %v291_v29 }
 0x256   : > { %552 = shalt.err (!%p549_p10)
}
 0x257   : > { %s553_s5 = scalar_lea.hbm %s793_s27, 128  ;;  %s557_s18 = scalar_lea.hbm %s839_s2, 256 }
 0x258   : > { %p554_p1 = scmp.ne.s32.totalorder %s793_s27, %s553_s5  ;;  %p558_p3 = scmp.lt.u32.totalorder %s793_s27, %s839_s2 }
 0x259   : > { %p559_p11 = scmp.lt.u32.totalorder %s557_s18, %s553_s5  ;;  %p561_p6 = scmp.lt.u32.totalorder %s553_s5, %s793_s27 }
 0x25a   : > { %p555_p2 = pnand %p554_p1, %p724_p8 }
 0x25b   : > { %p560_p4 = por %p559_p11, %p558_p3 }
 0x25c   : > { %p556_p7 = pneg %p555_p2 }
 0x25d   : > { %p562_p9 = por %p561_p6, %p560_p4 }
 0x25f   : > { %p563_p12 = pnand %p562_p9, %p556_p7 }
 0x261   : > { %566 = shalt.err (!%p563_p12)
}
 0x262   : > { %422 = dma.vmem_to_hbm [thread:$0]  (%p724_p8), %s795_s19, 128, %s793_s27, %s294_s29  }
 0x263 PF: > { %s320_s25 = sand.u32 1, %s597_s9   ;;  %p858_p13 = scmp.ne.s32.totalorder %s844_s16, 0 }
 0x264   : > { %p859_p0 = scmp.ge.s32.totalorder %s609_s12, 2  ;;  %s321_s23 = scalar_lea.sflag [#allocation4], %s320_s25 }
 0x266   : > { %p433_p5 = pnand %p859_p0, %p858_p13 }
 0x268   : > { %592 = dma.done.wait (!%p433_p5), %s321_s23, 128  }
 0x269   : > { %594 = vsyncadd (!%p433_p5), %s321_s23, 4294967168  ;;  %p16_p10 = scmp.ge.s32.totalorder %s680_s20, 4   ;;  %s860_s9 = smov %s601_s10 }
 0x26a   : > { %s861_s10 = smov %s605_s11  ;;  %s862_s11 = smov %s716_s7 }
 0x26b   : > { %s863_s12 = smov %s680_s20  ;;  %18 = sbr.rel (!%p16_p10) target bundleno = 6 (0x6), region = 77 }
 0x272   :  { %326 = vsyncpa [#allocation3], 1 }
 0x273   :  { %328 = vsyncpa [#allocation3 + $0x1], 1 }
 0x274   :  { %329 = vsyncpa [#allocation6], 1 }
 0x275   :  { %330 = vsyncpa [#allocation4], 1 }
 0x276   :  { %332 = vsyncpa [#allocation4 + $0x1], 1 }

</bundles_post_ra>
